<compile_context>
chip_gen: v7x
topology: tpu7x:2x2x1
jax: 0.10.0
libtpu: 0.0.40
codegen_flags: <defaults>
</compile_context>

<pallas_src>
import jax
import jax.numpy as jnp
from jax.experimental import pallas as pl
from jax.experimental.pallas import tpu as pltpu

_EPS = 1e-6      # torch F.pairwise_distance default eps
_LANES = 128


def _round_up(v, m):
    return (v + m - 1) // m * m


def _make_triplet_kernel(tm, e_real):
    """tm: per-step batch tile size; e_real: unpadded embedding width."""

    def kernel(xyz_ref, w_ref, b_ref, emb_ref, dist_ref):
        e_pad = w_ref.shape[1]

        # One MXU matmul for the stacked (x|y|z) tile: (3*tm, Din) @ (Din, Epad).
        acc = jnp.dot(xyz_ref[...], w_ref[...],
                      preferred_element_type=jnp.float32)
        emb = acc + b_ref[...]                       # f32 epilogue (bias)
        emb_ref[...] = emb.astype(emb_ref.dtype)     # single lane-dense store

        ex = emb[0 * tm:1 * tm, :]
        ey = emb[1 * tm:2 * tm, :]
        ez = emb[2 * tm:3 * tm, :]

        # eps only on the real E columns so zero-padded columns contribute 0
        # exactly (matches torch semantics on the unpadded width).
        col = jax.lax.broadcasted_iota(jnp.int32, (1, e_pad), 1)
        eps_row = jnp.where(col < e_real, jnp.float32(_EPS), jnp.float32(0.0))

        def l2(a, c):
            d = a - c + eps_row
            return jnp.sqrt(jnp.sum(d * d, axis=-1, keepdims=True))  # (tm, 1)

        dap = l2(ex, ey)
        dan = l2(ex, ez)
        dpn = l2(ey, ez)

        # Lane-dense (tm, 128) distance slab: lane 0 = ap, 1 = an, 2 = pn.
        lane = jax.lax.broadcasted_iota(jnp.int32, (tm, _LANES), 1)
        dist_ref[...] = (jnp.where(lane == 0, dap, 0.0)
                         + jnp.where(lane == 1, dan, 0.0)
                         + jnp.where(lane == 2, dpn, 0.0))

    return kernel


def triplet_net(x, y, z, w, b, *, matmul_dtype=jnp.bfloat16):
    """TripletNet forward with a linear embedding net.

    x, y, z : (B, C, H, W) float32
    w       : (C*H*W, E)   embedding weight
    b       : (E,)         embedding bias
    Returns (dist_ap, dist_an, dist_pn, embedded_x, embedded_y, embedded_z).
    """
    B = x.shape[0]
    Din = x.shape[1] * x.shape[2] * x.shape[3]
    E = w.shape[1]

    itemsize = jnp.dtype(matmul_dtype).itemsize
    sub = max(8, 32 // itemsize)                 # sublane packing: 8 f32 / 16 bf16

    Din_pad = _round_up(Din, _LANES)
    E_pad = _round_up(E, _LANES)
    TM = min(128, _round_up(B, sub))             # batch rows per grid step
    B_pad = _round_up(B, TM)
    n_t = B_pad // TM

    # Flatten (row-major, same ordering as torch.flatten) and stack the triplet.
    xf = x.reshape(B, Din)
    yf = y.reshape(B, Din)
    zf = z.reshape(B, Din)
    xyz = jnp.stack([xf, yf, zf], axis=0)                         # (3, B, Din)
    xyz = jnp.pad(xyz, ((0, 0), (0, B_pad - B), (0, Din_pad - Din)))
    # Interleave per batch-tile so each grid step gets its x/y/z rows as one
    # contiguous (3*TM, Din_pad) block -> ONE matmul reusing W for all three.
    stacked = (xyz.reshape(3, n_t, TM, Din_pad)
                  .transpose(1, 0, 2, 3)
                  .reshape(n_t * 3 * TM, Din_pad)
                  .astype(matmul_dtype))

    w_p = jnp.pad(w, ((0, Din_pad - Din), (0, E_pad - E))).astype(matmul_dtype)
    b_p = jnp.pad(b.reshape(1, E), ((0, 0), (0, E_pad - E))).astype(jnp.float32)

    cost = pl.CostEstimate(
        flops=2 * 3 * B_pad * Din_pad * E_pad,
        transcendentals=3 * B_pad,               # sqrt in the distance epilogue
        bytes_accessed=(stacked.size * stacked.dtype.itemsize
                        + w_p.size * w_p.dtype.itemsize
                        + b_p.size * 4
                        + 3 * B_pad * E_pad * 4
                        + B_pad * _LANES * 4),
    )

    emb2d, dist2d = pl.pallas_call(
        _make_triplet_kernel(TM, E),
        grid=(n_t,),
        in_specs=[
            pl.BlockSpec((3 * TM, Din_pad), lambda i: (i, 0)),    # stacked x|y|z
            pl.BlockSpec((Din_pad, E_pad), lambda i: (0, 0)),     # W (grid-invariant)
            pl.BlockSpec((1, E_pad), lambda i: (0, 0)),           # bias
        ],
        out_specs=(
            pl.BlockSpec((3 * TM, E_pad), lambda i: (i, 0)),      # embeddings
            pl.BlockSpec((TM, _LANES), lambda i: (i, 0)),         # distance slab
        ),
        out_shape=(
            jax.ShapeDtypeStruct((n_t * 3 * TM, E_pad), jnp.float32),
            jax.ShapeDtypeStruct((B_pad, _LANES), jnp.float32),
        ),
        compiler_params=pltpu.CompilerParams(
            dimension_semantics=("parallel",)),   # batch axis -> megacore-splittable
        cost_estimate=cost,
    )(stacked, w_p, b_p)

    # Undo the per-tile interleave; strip batch / feature padding.
    emb = (emb2d.reshape(n_t, 3, TM, E_pad)
                .transpose(1, 0, 2, 3)
                .reshape(3, B_pad, E_pad))
    ex = emb[0, :B, :E]
    ey = emb[1, :B, :E]
    ez = emb[2, :B, :E]
    dist_ap = dist2d[:B, 0]
    dist_an = dist2d[:B, 1]
    dist_pn = dist2d[:B, 2]
    return dist_ap, dist_an, dist_pn, ex, ey, ez


def _reference(x, y, z, w, b, matmul_dtype=jnp.float32):
    """Pure-JAX reference (optionally with the same matmul precision policy)."""
    B = x.shape[0]
    wm = w.astype(matmul_dtype)

    def embed(v):
        vf = v.reshape(B, -1).astype(matmul_dtype)
        return jnp.dot(vf, wm, preferred_element_type=jnp.float32) + b

    ex, ey, ez = embed(x), embed(y), embed(z)

    def l2(a, c):
        d = a - c + _EPS
        return jnp.sqrt(jnp.sum(d * d, axis=-1))

    return l2(ex, ey), l2(ex, ez), l2(ey, ez), ex, ey, ez


if __name__ == "__main__":
    B, C, H, W = 2, 4, 16, 16
    E = 32
    Din = C * H * W

    key = jax.random.PRNGKey(0)
    kx, ky, kz, kw, kb = jax.random.split(key, 5)

    x = jax.random.normal(kx, (B, C, H, W), dtype=jnp.float32)
    y = jax.random.normal(ky, (B, C, H, W), dtype=jnp.float32)
    z = jax.random.normal(kz, (B, C, H, W), dtype=jnp.float32)

    # Deterministic synthetic embedding-net parameters.
    w = jax.random.normal(kw, (Din, E), dtype=jnp.float32) * (1.0 / Din ** 0.5)
    b = jax.random.normal(kb, (E,), dtype=jnp.float32) * 0.01

    outs = triplet_net(x, y, z, w, b)            # bf16 MXU path, f32 epilogue
    outs = jax.block_until_ready(outs)

    # Tight check against a reference with the same matmul precision policy.
    refs_bf16 = _reference(x, y, z, w, b, matmul_dtype=jnp.bfloat16)
    for o, r in zip(outs, refs_bf16):
        assert o.shape == r.shape, (o.shape, r.shape)
        err = float(jnp.max(jnp.abs(o - r)))
        assert jnp.allclose(o, r, atol=2e-3, rtol=2e-3), err

    # Loose sanity check against the full-f32 reference (bf16 matmul rounding).
    refs_f32 = _reference(x, y, z, w, b, matmul_dtype=jnp.float32)
    for o, r in zip(outs, refs_f32):
        err = float(jnp.max(jnp.abs(o - r)))
        assert jnp.allclose(o, r, atol=5e-2, rtol=5e-2), err

    print("KERNEL_OK")
</pallas_src>

<mosaic_0001>
module attributes {stable_mosaic.version = 11 : i64} {
  func.func @kernel(%arg0: i32, %arg1: memref<48x1024xbf16, #tpu.memory_space<vmem>>, %arg2: memref<1024x128xbf16, #tpu.memory_space<vmem>>, %arg3: memref<1x128xf32, #tpu.memory_space<vmem>>, %arg4: memref<48x128xf32, #tpu.memory_space<vmem>>, %arg5: memref<16x128xf32, #tpu.memory_space<vmem>>) attributes {dimension_semantics = [#tpu.dimension_semantics<parallel>], iteration_bounds = array<i64: 1>, scalar_prefetch = 0 : i64, scratch_operands = 0 : i64, tpu.core_type = #tpu.core_type<tc>, window_params = [{transform_indices = @transform_0, window_bounds = array<i64: 48, 1024>}, {pipeline_mode = #tpu.pipeline_mode<synchronous>, transform_indices = @transform_1, window_bounds = array<i64: 1024, 128>}, {pipeline_mode = #tpu.pipeline_mode<synchronous>, transform_indices = @transform_2, window_bounds = array<i64: 1, 128>}, {transform_indices = @transform_3, window_bounds = array<i64: 48, 128>}, {transform_indices = @transform_4, window_bounds = array<i64: 16, 128>}]} {
    %c0 = arith.constant 0 : index
    %c0_0 = arith.constant 0 : index
    %0 = vector.load %arg1[%c0, %c0_0] : memref<48x1024xbf16, #tpu.memory_space<vmem>>, vector<48x1024xbf16>
    %c0_1 = arith.constant 0 : index
    %c0_2 = arith.constant 0 : index
    %1 = vector.load %arg2[%c0_1, %c0_2] : memref<1024x128xbf16, #tpu.memory_space<vmem>>, vector<1024x128xbf16>
    %cst = arith.constant dense<0.000000e+00> : vector<48x128xf32>
    %2 = tpu.matmul %0, %1, %cst {dimension_numbers = #tpu.dot_dimension_numbers<[1], [0], [0], [1], [0, 0, 1, 1], [], []>} : vector<48x1024xbf16>, vector<1024x128xbf16>, vector<48x128xf32> -> vector<48x128xf32>
    %c0_3 = arith.constant 0 : index
    %c0_4 = arith.constant 0 : index
    %3 = vector.load %arg3[%c0_3, %c0_4] : memref<1x128xf32, #tpu.memory_space<vmem>>, vector<1x128xf32>
    %4 = vector.broadcast %3 : vector<1x128xf32> to vector<48x128xf32>
    %5 = arith.addf %2, %4 : vector<48x128xf32>
    %c0_5 = arith.constant 0 : index
    %c0_6 = arith.constant 0 : index
    %6 = vector.load %arg4[%c0_5, %c0_6] : memref<48x128xf32, #tpu.memory_space<vmem>>, vector<48x128xf32>
    tpu.vector_store %arg4[%c0_5, %c0_6], %5 {strides = array<i32>} : memref<48x128xf32, #tpu.memory_space<vmem>>, vector<48x128xf32>,
    %7 = vector.extract_strided_slice %5 {offsets = [0, 0], sizes = [16, 128], strides = [1, 1]} : vector<48x128xf32> to vector<16x128xf32>
    %8 = vector.extract_strided_slice %5 {offsets = [16, 0], sizes = [16, 128], strides = [1, 1]} : vector<48x128xf32> to vector<16x128xf32>
    %9 = vector.extract_strided_slice %5 {offsets = [32, 0], sizes = [16, 128], strides = [1, 1]} : vector<48x128xf32> to vector<16x128xf32>
    %10 = tpu.iota {dimensions = array<i32: 1>} : vector<1x128xi32>
    %c32_i32 = arith.constant 32 : i32
    %11 = vector.broadcast %c32_i32 : i32 to vector<1x128xi32>
    %12 = arith.cmpi slt, %10, %11 : vector<1x128xi32>
    %cst_7 = arith.constant 9.99999997E-7 : f32
    %cst_8 = arith.constant 0.000000e+00 : f32
    %13 = vector.broadcast %cst_7 : f32 to vector<1x128xf32>
    %14 = vector.broadcast %cst_8 : f32 to vector<1x128xf32>
    %15 = arith.select %12, %13, %14 : vector<1x128xi1>, vector<1x128xf32>
    %16 = arith.subf %7, %8 : vector<16x128xf32>
    %17 = vector.broadcast %15 : vector<1x128xf32> to vector<16x128xf32>
    %18 = arith.addf %16, %17 : vector<16x128xf32>
    %19 = arith.mulf %18, %18 : vector<16x128xf32>
    %cst_9 = arith.constant dense<0.000000e+00> : vector<16xf32>
    %20 = vector.multi_reduction <add>, %19, %cst_9 [1] : vector<16x128xf32> to vector<16xf32>
    %21 = vector.shape_cast %20 : vector<16xf32> to vector<16x1xf32>
    %22 = math.sqrt %21 : vector<16x1xf32>
    %23 = arith.subf %7, %9 : vector<16x128xf32>
    %24 = vector.broadcast %15 : vector<1x128xf32> to vector<16x128xf32>
    %25 = arith.addf %23, %24 : vector<16x128xf32>
    %26 = arith.mulf %25, %25 : vector<16x128xf32>
    %cst_10 = arith.constant dense<0.000000e+00> : vector<16xf32>
    %27 = vector.multi_reduction <add>, %26, %cst_10 [1] : vector<16x128xf32> to vector<16xf32>
    %28 = vector.shape_cast %27 : vector<16xf32> to vector<16x1xf32>
    %29 = math.sqrt %28 : vector<16x1xf32>
    %30 = arith.subf %8, %9 : vector<16x128xf32>
    %31 = vector.broadcast %15 : vector<1x128xf32> to vector<16x128xf32>
    %32 = arith.addf %30, %31 : vector<16x128xf32>
    %33 = arith.mulf %32, %32 : vector<16x128xf32>
    %cst_11 = arith.constant dense<0.000000e+00> : vector<16xf32>
    %34 = vector.multi_reduction <add>, %33, %cst_11 [1] : vector<16x128xf32> to vector<16xf32>
    %35 = vector.shape_cast %34 : vector<16xf32> to vector<16x1xf32>
    %36 = math.sqrt %35 : vector<16x1xf32>
    %37 = tpu.iota {dimensions = array<i32: 1>} : vector<16x128xi32>
    %c0_i32 = arith.constant 0 : i32
    %38 = vector.broadcast %c0_i32 : i32 to vector<16x128xi32>
    %39 = arith.cmpi eq, %37, %38 : vector<16x128xi32>
    %cst_12 = arith.constant 0.000000e+00 : f32
    %40 = vector.shape_cast %22 : vector<16x1xf32> to vector<16x1xf32>
    %41 = vector.broadcast %40 : vector<16x1xf32> to vector<16x128xf32>
    %42 = vector.broadcast %cst_12 : f32 to vector<16x128xf32>
    %43 = arith.select %39, %41, %42 : vector<16x128xi1>, vector<16x128xf32>
    %c1_i32 = arith.constant 1 : i32
    %44 = vector.broadcast %c1_i32 : i32 to vector<16x128xi32>
    %45 = arith.cmpi eq, %37, %44 : vector<16x128xi32>
    %cst_13 = arith.constant 0.000000e+00 : f32
    %46 = vector.shape_cast %29 : vector<16x1xf32> to vector<16x1xf32>
    %47 = vector.broadcast %46 : vector<16x1xf32> to vector<16x128xf32>
    %48 = vector.broadcast %cst_13 : f32 to vector<16x128xf32>
    %49 = arith.select %45, %47, %48 : vector<16x128xi1>, vector<16x128xf32>
    %50 = arith.addf %43, %49 : vector<16x128xf32>
    %c2_i32 = arith.constant 2 : i32
    %51 = vector.broadcast %c2_i32 : i32 to vector<16x128xi32>
    %52 = arith.cmpi eq, %37, %51 : vector<16x128xi32>
    %cst_14 = arith.constant 0.000000e+00 : f32
    %53 = vector.shape_cast %36 : vector<16x1xf32> to vector<16x1xf32>
    %54 = vector.broadcast %53 : vector<16x1xf32> to vector<16x128xf32>
    %55 = vector.broadcast %cst_14 : f32 to vector<16x128xf32>
    %56 = arith.select %52, %54, %55 : vector<16x128xi1>, vector<16x128xf32>
    %57 = arith.addf %50, %56 : vector<16x128xf32>
    %c0_15 = arith.constant 0 : index
    %c0_16 = arith.constant 0 : index
    %58 = vector.load %arg5[%c0_15, %c0_16] : memref<16x128xf32, #tpu.memory_space<vmem>>, vector<16x128xf32>
    tpu.vector_store %arg5[%c0_15, %c0_16], %57 {strides = array<i32>} : memref<16x128xf32, #tpu.memory_space<vmem>>, vector<16x128xf32>,
    return
  }
  func.func @transform_0(%arg0: i32) -> (i32, i32) {
    %c0_i32 = arith.constant 0 : i32
    %c0_i32_0 = arith.constant 0 : i32
    return %arg0, %c0_i32 : i32, i32
  }
  func.func @transform_1(%arg0: i32) -> (i32, i32) {
    %c0_i32 = arith.constant 0 : i32
    %c0_i32_0 = arith.constant 0 : i32
    %c0_i32_1 = arith.constant 0 : i32
    return %c0_i32, %c0_i32_0 : i32, i32
  }
  func.func @transform_2(%arg0: i32) -> (i32, i32) {
    %c0_i32 = arith.constant 0 : i32
    %c0_i32_0 = arith.constant 0 : i32
    %c0_i32_1 = arith.constant 0 : i32
    return %c0_i32, %c0_i32_0 : i32, i32
  }
  func.func @transform_3(%arg0: i32) -> (i32, i32) {
    %c0_i32 = arith.constant 0 : i32
    %c0_i32_0 = arith.constant 0 : i32
    return %arg0, %c0_i32 : i32, i32
  }
  func.func @transform_4(%arg0: i32) -> (i32, i32) {
    %c0_i32 = arith.constant 0 : i32
    %c0_i32_0 = arith.constant 0 : i32
    return %arg0, %c0_i32 : i32, i32
  }
}

</mosaic_0001>

<bundles_post_ra>
// kernel: tpu_custom_call.1
= control target key start
LH: loop header
LB: loop body
LE: loop exit
PB: predicated region body
PF: predicated region fallthrough
CT: control target
= control target key end

     0   :  { %10 = vsyncpa [#allocation3], 0  ;;  %s1588_s0 = inlined_call_operand.hbm [shape: bf16[48,1024], index: 0, kind: input, shape index: {}]   ;;  %s1589_s1 = inlined_call_operand.hbm [shape: bf16[1024,128], index: 1, kind: input, shape index: {}]   ;;  %s1590_s2 = inlined_call_operand.vmem [shape: f32[1,128], index: 2, kind: input, shape index: {}]   ;;  %s1591_s3 = inlined_call_operand.hbm [shape: f32[48,128], index: 3, kind: output, shape index: {0}]   ;;  %s1592_s4 = inlined_call_operand.hbm [shape: f32[16,128], index: 4, kind: output, shape index: {1}]  }
   0x1   :  { %11 = vsyncpa [#allocation6], 0 }
   0x2   :  { %12 = vsyncpa [#allocation4], 0 }
   0x3   :  { %13 = vsyncpa [#allocation9], 0  ;;  %s1477_s15 = smov [#allocation2]   ;;  %s1381_s19 = scalar_lea.hbm %s1588_s0, 3072 }
   0x4   :  { %s19_s16 = sshll.u32 %s1477_s15, 4  ;;  %p1382_p0 = scmp.ne.s32.totalorder %s1588_s0, %s1381_s19  ;;  %s20_s16 = int_to_ptr.vmem [resolvable:$true] %s19_s16 }
   0x5   :  { %p1385_p1 = scmp.lt.u32.totalorder %s1381_s19, %s1588_s0 }
   0x7   :  { %p1387_p2 = pnand %p1385_p1, %p1382_p0 }
   0x9   :  { %1390 = shalt.err (!%p1387_p2)
}
   0xa   :  { %s1391_s24 = scalar_lea.vmem %s20_s16, 3072  ;;  %p1396_p4 = scmp.lt.s32.totalorder %s20_s16, %s20_s16 }
   0xb   :  { %p1392_p3 = scmp.ne.s32.totalorder %s20_s16, %s1391_s24  ;;  %p1397_p5 = scmp.lt.s32.totalorder %s1391_s24, %s1391_s24 }
   0xd   :  { %p1398_p6 = por %p1397_p5, %p1396_p4 }
   0xf   :  { %p1399_p7 = pnand %p1398_p6, %p1392_p3 }
  0x11   :  { %1402 = shalt.err (!%p1399_p7)
}
  0x12   :  { %s1478_s25 = smov 512   ;;  %s1479_s26 = smov 32  }
  0x13   :  { %25 = dma.hbm_to_vmem [thread:$0]  %s1588_s0, 3072, %s20_s16, [#allocation3], %s1478_s25, %s1478_s25, %s1479_s26  }
  0x14   :  { %s1480_s29 = smov [#allocation5]   ;;  %s1403_s7 = scalar_lea.hbm %s1589_s1, 8192 }
  0x15   :  { %s31_s30 = sshll.u32 %s1480_s29, 4  ;;  %p1404_p8 = scmp.ne.s32.totalorder %s1589_s1, %s1403_s7  ;;  %s32_s30 = int_to_ptr.vmem [resolvable:$true] %s31_s30 }
  0x16   :  { %p1407_p9 = scmp.lt.u32.totalorder %s1403_s7, %s1589_s1 }
  0x18   :  { %p1409_p10 = pnand %p1407_p9, %p1404_p8 }
  0x1a   :  { %1412 = shalt.err (!%p1409_p10)
}
  0x1b   :  { %s1413_s12 = scalar_lea.vmem %s32_s30, 8192  ;;  %p1418_p12 = scmp.lt.s32.totalorder %s32_s30, %s32_s30 }
  0x1c   :  { %p1414_p11 = scmp.ne.s32.totalorder %s32_s30, %s1413_s12  ;;  %p1419_p13 = scmp.lt.s32.totalorder %s1413_s12, %s1413_s12 }
  0x1e   :  { %p1420_p0 = por %p1419_p13, %p1418_p12 }
  0x20   :  { %p1421_p1 = pnand %p1420_p0, %p1414_p11 }
  0x22   :  { %1424 = shalt.err (!%p1421_p1)
}
  0x23   :  { %s1481_s0 = smov 64   ;;  %s1482_s13 = smov 4  }
  0x24   :  { %37 = dma.hbm_to_vmem [thread:$0]  %s1589_s1, 8192, %s32_s30, [#allocation6], %s1481_s0, %s1481_s0, %s1482_s13  }
  0x25   :  { %1469 = dma.done.wait [#allocation3], 3072  }
  0x26   :  { %1470 = vsyncadd [#allocation3], 4294964224 }
  0x27   :  { %1471 = dma.done.wait [#allocation6], 8192  }
  0x28   :  { %1472 = vsyncadd [#allocation6], 4294959104  ;;  %v1305_v0 = vld [vmem:[#allocation5 + $0x40] sm:$0xff]   ;;  %v1309_v4 = vld [vmem:[#allocation5 + $0x48] sm:$0xff]  }
  0x29   :  { %v1306_v1 = vld [vmem:[#allocation5 + $0xc0] sm:$0xff]   ;;  %1158 = vmatprep.subr.bf16.mxu0 %v1305_v0  ;;  %v1310_v5 = vld [vmem:[#allocation5 + $0xc8] sm:$0xff]   ;;  %v1313_v8 = vld [vmem:[#allocation5 + $0x50] sm:$0xff]  }
  0x2a   :  { %v1307_v2 = vld [vmem:[#allocation5] sm:$0xff]   ;;  %1192 = vmatprep.subr.bf16.mxu1 %v1306_v1  ;;  %v1311_v6 = vld [vmem:[#allocation5 + $0x8] sm:$0xff]   ;;  %v1314_v9 = vld [vmem:[#allocation5 + $0xd0] sm:$0xff]  }
  0x2b   :  { %v1308_v3 = vld [vmem:[#allocation5 + $0x80] sm:$0xff]   ;;  %1159 = vmatpush3.bf16.msra.mxu0 %v1307_v2  ;;  %v1312_v7 = vld [vmem:[#allocation5 + $0x88] sm:$0xff]   ;;  %v1315_v10 = vld [vmem:[#allocation5 + $0x10] sm:$0xff]  }
  0x2c   :  { %1193 = vmatpush3.bf16.msra.mxu1 %v1308_v3  ;;  %1160 = vmatprep.subr.bf16.mxu0 %v1309_v4  ;;  %v1316_v11 = vld [vmem:[#allocation5 + $0x90] sm:$0xff]   ;;  %v1317_v12 = vld [vmem:[#allocation5 + $0x58] sm:$0xff]   ;;  %v1321_v16 = vld [vmem:[#allocation5 + $0x60] sm:$0xff]  }
  0x2d   :  { %1194 = vmatprep.subr.bf16.mxu1 %v1310_v5  ;;  %v1318_v13 = vld [vmem:[#allocation5 + $0xd8] sm:$0xff]   ;;  %v1322_v17 = vld [vmem:[#allocation5 + $0xe0] sm:$0xff]   ;;  %v1325_v20 = vld [vmem:[#allocation5 + $0x68] sm:$0xff]  }
  0x2e   :  { %v1319_v14 = vld [vmem:[#allocation5 + $0x18] sm:$0xff]   ;;  %v1323_v18 = vld [vmem:[#allocation5 + $0x20] sm:$0xff]   ;;  %v1326_v21 = vld [vmem:[#allocation5 + $0xe8] sm:$0xff]  }
  0x2f   :  { %1161 = vmatpush3.bf16.msra.mxu0 %v1311_v6  ;;  %v1320_v15 = vld [vmem:[#allocation5 + $0x98] sm:$0xff]   ;;  %v1324_v19 = vld [vmem:[#allocation5 + $0xa0] sm:$0xff]   ;;  %v1327_v22 = vld [vmem:[#allocation5 + $0x28] sm:$0xff]  }
  0x30   :  { %1195 = vmatpush3.bf16.msra.mxu1 %v1312_v7  ;;  %1162 = vmatprep.subr.bf16.mxu0 %v1313_v8  ;;  %v1328_v23 = vld [vmem:[#allocation5 + $0xa8] sm:$0xff]   ;;  %v1329_v24 = vld [vmem:[#allocation5 + $0x70] sm:$0xff]   ;;  %v1333_v28 = vld [vmem:[#allocation5 + $0x78] sm:$0xff]  }
  0x31   :  { %1196 = vmatprep.subr.bf16.mxu1 %v1314_v9  ;;  %v1330_v25 = vld [vmem:[#allocation5 + $0xf0] sm:$0xff]   ;;  %v1334_v29 = vld [vmem:[#allocation5 + $0xf8] sm:$0xff]   ;;  %v47_v32 = vld [vmem:[#allocation2] sm:$0xff] }
  0x32   :  { %v1331_v26 = vld [vmem:[#allocation5 + $0x30] sm:$0xff]   ;;  %v1335_v30 = vld [vmem:[#allocation5 + $0x38] sm:$0xff]   ;;  %v51_v33 = vld [vmem:[#allocation2 + $0x20] sm:$0xff] }
  0x33   :  { %1163 = vmatpush3.bf16.msra.mxu0 %v1315_v10  ;;  %v1332_v27 = vld [vmem:[#allocation5 + $0xb0] sm:$0xff]   ;;  %v1336_v31 = vld [vmem:[#allocation5 + $0xb8] sm:$0xff]   ;;  %v48_v34 = vld [vmem:[#allocation2 + $0x8] sm:$0xff]  ;;  %v1070_v35 = vcombine.low %v47_v32, %v51_v33  ;;  %v1071_v36 = vcombine.high %v47_v32, %v51_v33 }
  0x34   :  { %1197 = vmatpush3.bf16.msra.mxu1 %v1316_v11  ;;  %1164 = vmatprep.subr.bf16.mxu0 %v1317_v12  ;;  %v52_v37 = vld [vmem:[#allocation2 + $0x28] sm:$0xff]  ;;  %v1337_v40 = vld [vmem:[#allocation5 + $0x140] sm:$0xff]   ;;  %v1345_v48 = vld [vmem:[#allocation5 + $0x150] sm:$0xff]  }
  0x35   :  { %1198 = vmatprep.subr.bf16.mxu1 %v1318_v13  ;;  %v1072_v38 = vcombine.low %v48_v34, %v52_v37  ;;  %v1073_v39 = vcombine.high %v48_v34, %v52_v37  ;;  %742 = vmatprep.mubr.bf16.mxu0 %v1071_v36  ;;  %v1338_v41 = vld [vmem:[#allocation5 + $0x1c0] sm:$0xff]   ;;  %v1341_v44 = vld [vmem:[#allocation5 + $0x148] sm:$0xff]   ;;  %v1346_v49 = vld [vmem:[#allocation5 + $0x1d0] sm:$0xff]  }
  0x36   :  { %v1339_v42 = vld [vmem:[#allocation5 + $0x100] sm:$0xff]   ;;  %v1342_v45 = vld [vmem:[#allocation5 + $0x1c8] sm:$0xff]   ;;  %v1347_v50 = vld [vmem:[#allocation5 + $0x110] sm:$0xff]  }
  0x37   :  { %1165 = vmatpush3.bf16.msra.mxu0 %v1319_v14  ;;  %799 = vmatprep.mubr.bf16.mxu1 %v1073_v39  ;;  %v1340_v43 = vld [vmem:[#allocation5 + $0x180] sm:$0xff]   ;;  %v1343_v46 = vld [vmem:[#allocation5 + $0x108] sm:$0xff]   ;;  %v1348_v51 = vld [vmem:[#allocation5 + $0x190] sm:$0xff]  }
  0x38   :  { %1199 = vmatpush3.bf16.msra.mxu1 %v1320_v15  ;;  %1166 = vmatprep.subr.bf16.mxu0 %v1321_v16  ;;  %v1344_v47 = vld [vmem:[#allocation5 + $0x188] sm:$0xff]   ;;  %v55_v52 = vld [vmem:[#allocation2 + $0x40] sm:$0xff]  ;;  %v1349_v55 = vld [vmem:[#allocation5 + $0x158] sm:$0xff]  }
  0x39   :  { %1200 = vmatprep.subr.bf16.mxu1 %v1322_v17  ;;  %v59_v53 = vld [vmem:[#allocation2 + $0x60] sm:$0xff]  ;;  %v1350_v57 = vld [vmem:[#allocation5 + $0x1d8] sm:$0xff]   ;;  %v56_v60 = vld [vmem:[#allocation2 + $0x48] sm:$0xff] }
  0x3a   :  { %v1079_v54 = vcombine.high %v55_v52, %v59_v53  ;;  %v1078_v56 = vcombine.low %v55_v52, %v59_v53  ;;  %v1351_v58 = vld [vmem:[#allocation5 + $0x118] sm:$0xff]   ;;  %v60_v61 = vld [vmem:[#allocation2 + $0x68] sm:$0xff]  ;;  %v1353_v0 = vld [vmem:[#allocation5 + $0x160] sm:$0xff]  }
  0x3b   :  { %1167 = vmatpush3.bf16.msra.mxu0 %v1323_v18  ;;  %v1352_v59 = vld [vmem:[#allocation5 + $0x198] sm:$0xff]   ;;  %v1081_v62 = vcombine.high %v56_v60, %v60_v61  ;;  %v1080_v63 = vcombine.low %v56_v60, %v60_v61  ;;  %v1354_v1 = vld [vmem:[#allocation5 + $0x1e0] sm:$0xff]   ;;  %v1357_v7 = vld [vmem:[#allocation5 + $0x168] sm:$0xff]  }
  0x3c   :  { %1201 = vmatpush3.bf16.msra.mxu1 %v1324_v19  ;;  %1168 = vmatprep.subr.bf16.mxu0 %v1325_v20  ;;  %v1355_v2 = vld [vmem:[#allocation5 + $0x120] sm:$0xff]   ;;  %v1358_v9 = vld [vmem:[#allocation5 + $0x1e8] sm:$0xff]   ;;  %v1361_v16 = vld [vmem:[#allocation5 + $0x170] sm:$0xff]  }
  0x3d   :  { %1202 = vmatprep.subr.bf16.mxu1 %v1326_v21  ;;  %v1356_v3 = vld [vmem:[#allocation5 + $0x1a0] sm:$0xff]   ;;  %v1359_v10 = vld [vmem:[#allocation5 + $0x128] sm:$0xff]   ;;  %v1362_v17 = vld [vmem:[#allocation5 + $0x1f0] sm:$0xff]  }
  0x3e   :  { %v63_v4 = vld [vmem:[#allocation2 + $0x80] sm:$0xff]  ;;  %v1360_v11 = vld [vmem:[#allocation5 + $0x1a8] sm:$0xff]   ;;  %v1363_v18 = vld [vmem:[#allocation5 + $0x130] sm:$0xff]  }
  0x3f   :  { %1169 = vmatpush3.bf16.msra.mxu0 %v1327_v22  ;;  %v67_v5 = vld [vmem:[#allocation2 + $0xa0] sm:$0xff]  ;;  %v64_v12 = vld [vmem:[#allocation2 + $0x88] sm:$0xff]  ;;  %v1364_v19 = vld [vmem:[#allocation5 + $0x1b0] sm:$0xff]  }
  0x40   :  { %1203 = vmatpush3.bf16.msra.mxu1 %v1328_v23  ;;  %1170 = vmatprep.subr.bf16.mxu0 %v1329_v24  ;;  %v1087_v6 = vcombine.high %v63_v4, %v67_v5  ;;  %v1086_v8 = vcombine.low %v63_v4, %v67_v5  ;;  %v68_v13 = vld [vmem:[#allocation2 + $0xa8] sm:$0xff]  ;;  %v1365_v20 = vld [vmem:[#allocation5 + $0x178] sm:$0xff]   ;;  %v49_v24 = vld [vmem:[#allocation2 + $0x10] sm:$0xff] }
  0x41   :  { %1204 = vmatprep.subr.bf16.mxu1 %v1330_v25  ;;  %v1089_v14 = vcombine.high %v64_v12, %v68_v13  ;;  %v1088_v15 = vcombine.low %v64_v12, %v68_v13  ;;  %v1366_v21 = vld [vmem:[#allocation5 + $0x1f8] sm:$0xff]   ;;  %v53_v25 = vld [vmem:[#allocation2 + $0x30] sm:$0xff] }
  0x42   :  { %v1367_v22 = vld [vmem:[#allocation5 + $0x138] sm:$0xff]   ;;  %v69_v39 = vld [vmem:[#allocation2 + $0xb0] sm:$0xff] }
  0x43   :  { %1171 = vmatpush3.bf16.msra.mxu0 %v1331_v26  ;;  %v1368_v23 = vld [vmem:[#allocation5 + $0x1b8] sm:$0xff]  }
  0x44   :  { %1205 = vmatpush3.bf16.msra.mxu1 %v1332_v27  ;;  %1172 = vmatprep.subr.bf16.mxu0 %v1333_v28  ;;  %v50_v26 = vld [vmem:[#allocation2 + $0x18] sm:$0xff]  ;;  %v1074_v27 = vcombine.low %v49_v24, %v53_v25  ;;  %v1075_v28 = vcombine.high %v49_v24, %v53_v25 }
  0x45   :  { %1206 = vmatprep.subr.bf16.mxu1 %v1334_v29  ;;  %v54_v29 = vld [vmem:[#allocation2 + $0x38] sm:$0xff] }
  0x46   :  { %v1076_v32 = vcombine.low %v50_v26, %v54_v29  ;;  %v1077_v33 = vcombine.high %v50_v26, %v54_v29  ;;  %v62_v36 = vld [vmem:[#allocation2 + $0x78] sm:$0xff] }
  0x47   :  { %1173 = vmatpush3.bf16.msra.mxu0 %v1335_v30  ;;  %v57_v30 = vld [vmem:[#allocation2 + $0x50] sm:$0xff] }
  0x48   :  { %1207 = vmatpush3.bf16.msra.mxu1 %v1336_v31  ;;  %1226 = vmatprep.subr.bf16.mxu0 %v1337_v40  ;;  %v61_v31 = vld [vmem:[#allocation2 + $0x70] sm:$0xff]  ;;  %v66_v40 = vld [vmem:[#allocation2 + $0x98] sm:$0xff] }
  0x49   :  { %1260 = vmatprep.subr.bf16.mxu1 %v1338_v41  ;;  %v1083_v34 = vcombine.high %v57_v30, %v61_v31  ;;  %v70_v41 = vld [vmem:[#allocation2 + $0xb8] sm:$0xff] }
  0x4a   :  { %743 = vmatmul.mubr.bf16.vlgmr.msra.gmra.mrb[0].mxu0 %v1070_v35  ;;  %v58_v35 = vld [vmem:[#allocation2 + $0x58] sm:$0xff] }
  0x4b   :  { %800 = vmatmul.mubr.bf16.vlgmr.msra.gmra.mrb[0].mxu1 %v1072_v38  ;;  %1227 = vmatpush3.bf16.msra.mxu0 %v1339_v42  ;;  %v1085_v37 = vcombine.high %v58_v35, %v62_v36  ;;  %v65_v38 = vld [vmem:[#allocation2 + $0x90] sm:$0xff]  ;;  %v1082_v42 = vcombine.low %v57_v30, %v61_v31 }
  0x4c   :  { %1261 = vmatpush3.bf16.msra.mxu1 %v1340_v43  ;;  %1228 = vmatprep.subr.bf16.mxu0 %v1341_v44  ;;  %v1084_v43 = vcombine.low %v58_v35, %v62_v36  ;;  %v1091_v44 = vcombine.high %v65_v38, %v69_v39 }
  0x4d   :  { %1262 = vmatprep.subr.bf16.mxu1 %v1342_v45  ;;  %750 = vmatprep.mubr.bf16.mxu0 %v1079_v54  ;;  %v1093_v45 = vcombine.high %v66_v40, %v70_v41 }
  0x4e   :  { %807 = vmatprep.mubr.bf16.mxu1 %v1081_v62 }
  0x4f   :  { %1229 = vmatpush3.bf16.msra.mxu0 %v1343_v46  ;;  %v1090_v46 = vcombine.low %v65_v38, %v69_v39 }
  0x50   :  { %1263 = vmatpush3.bf16.msra.mxu1 %v1344_v47  ;;  %1230 = vmatprep.subr.bf16.mxu0 %v1345_v48  ;;  %v1092_v47 = vcombine.low %v66_v40, %v70_v41 }
  0x51   :  { %1264 = vmatprep.subr.bf16.mxu1 %v1346_v49 }
  0x52   :  { %751 = vmatmul.mubr.bf16.gmra.mrb[4].mxu0 %v1078_v56 }
  0x53   :  { %1231 = vmatpush3.bf16.msra.mxu0 %v1347_v50  ;;  %808 = vmatmul.mubr.bf16.gmra.mrb[4].mxu1 %v1080_v63  ;;  %v1069_v50 = vld [vmem:[%s1590_s2] ss:$0 sm:$0xff]  ;;  %s1484_s2 = smov [#allocation7]  }
  0x54   :  { %1265 = vmatpush3.bf16.msra.mxu1 %v1348_v51  ;;  %1232 = vmatprep.subr.bf16.mxu0 %v1349_v55  ;;  %s1040_s17 = sshll.u32 %s1484_s2, 4  ;;  %s1041_s17 = int_to_ptr.vmem [resolvable:$true] %s1040_s17 }
  0x55   :  { %1266 = vmatprep.subr.bf16.mxu1 %v1350_v57  ;;  %758 = vmatprep.mubr.bf16.mxu0 %v1087_v6  ;;  %s1425_s18 = scalar_lea.vmem %s1041_s17, 768  ;;  %p1430_p3 = scmp.lt.s32.totalorder %s1041_s17, %s1041_s17 }
  0x56   :  { %815 = vmatprep.mubr.bf16.mxu1 %v1089_v14  ;;  %p1426_p2 = scmp.ne.s32.totalorder %s1041_s17, %s1425_s18  ;;  %p1431_p4 = scmp.lt.s32.totalorder %s1425_s18, %s1425_s18 }
  0x57   :  { %1233 = vmatpush3.bf16.msra.mxu0 %v1351_v58 }
  0x58   :  { %1267 = vmatpush3.bf16.msra.mxu1 %v1352_v59  ;;  %1234 = vmatprep.subr.bf16.mxu0 %v1353_v0  ;;  %p1432_p5 = por %p1431_p4, %p1430_p3 }
  0x59   :  { %1268 = vmatprep.subr.bf16.mxu1 %v1354_v1 }
  0x5a   :  { %759 = vmatmul.mubr.bf16.gmra.mrb[8].mxu0 %v1086_v8  ;;  %p1433_p6 = pnand %p1432_p5, %p1426_p2 }
  0x5b   :  { %1235 = vmatpush3.bf16.msra.mxu0 %v1355_v2  ;;  %816 = vmatmul.mubr.bf16.gmra.mrb[8].mxu1 %v1088_v15 }
  0x5c   :  { %1269 = vmatpush3.bf16.msra.mxu1 %v1356_v3  ;;  %1236 = vmatprep.subr.bf16.mxu0 %v1357_v7 }
  0x5d   :  { %1270 = vmatprep.subr.bf16.mxu1 %v1358_v9  ;;  %856 = vmatprep.mubr.bf16.mxu0 %v1075_v28 }
  0x5e   :  { %913 = vmatprep.mubr.bf16.mxu1 %v1077_v33 }
  0x5f   :  { %1237 = vmatpush3.bf16.msra.mxu0 %v1359_v10 }
  0x60   :  { %1271 = vmatpush3.bf16.msra.mxu1 %v1360_v11  ;;  %1238 = vmatprep.subr.bf16.mxu0 %v1361_v16 }
  0x61   :  { %1272 = vmatprep.subr.bf16.mxu1 %v1362_v17 }
  0x63   :  { %1239 = vmatpush3.bf16.msra.mxu0 %v1363_v18 }
  0x64   :  { %1273 = vmatpush3.bf16.msra.mxu1 %v1364_v19  ;;  %1240 = vmatprep.subr.bf16.mxu0 %v1365_v20 }
  0x65   :  { %1274 = vmatprep.subr.bf16.mxu1 %v1366_v21 }
  0x67   :  { %1241 = vmatpush3.bf16.msra.mxu0 %v1367_v22 }
  0x68   :  { %1275 = vmatpush3.bf16.msra.mxu1 %v1368_v23 }
  0x6a   :  { %857 = vmatmul.mubr.bf16.vlgmr.msra.gmra.mrb[12].mxu0 %v1074_v27 }
  0x6b   :  { %914 = vmatmul.mubr.bf16.vlgmr.msra.gmra.mrb[12].mxu1 %v1076_v32  ;;  %864 = vmatprep.mubr.bf16.mxu0 %v1083_v34 }
  0x6c   :  { %921 = vmatprep.mubr.bf16.mxu1 %v1085_v37 }
  0x72   :  { %865 = vmatmul.mubr.bf16.gmra.mrb[16].mxu0 %v1082_v42 }
  0x73   :  { %922 = vmatmul.mubr.bf16.gmra.mrb[16].mxu1 %v1084_v43  ;;  %872 = vmatprep.mubr.bf16.mxu0 %v1091_v44 }
  0x74   :  { %929 = vmatprep.mubr.bf16.mxu1 %v1093_v45  ;;  %v944_v45 = vlaneseq }
  0x7a   :  { %873 = vmatmul.mubr.bf16.gmra.mrb[20].mxu0 %v1090_v46 }
  0x7b   :  { %930 = vmatmul.mubr.bf16.gmra.mrb[20].mxu1 %v1092_v47 }
 0x11d   :  { %v1174_v48 = vpop.f32.mrb[0].mxu0 }
 0x11e   :  { %v1208_v49 = vpop.f32.mrb[0].mxu1  ;;  %v1175_v51 = vpop.f32.mrb[1].mxu0 }
 0x11f   :  { %v1176_v52 = vadd.f32 %v1175_v51, %v1174_v48  ;;  %v1209_v53 = vpop.f32.mrb[1].mxu1  ;;  %v1177_v54 = vpop.f32.mrb[2].mxu0  ;;  %v1540_v51 = vand.u32 127, %v944_v45 }
 0x120   :  { %v1210_v55 = vadd.f32 %v1209_v53, %v1208_v49  ;;  %v1211_v56 = vpop.f32.mrb[2].mxu1  ;;  %v1178_v57 = vpop.f32.mrb[3].mxu0 }
 0x121   :  { %v745_v58 = vadd.f32 %v1176_v52, %v1069_v50  ;;  %v1179_v59 = vadd.f32 %v1178_v57, %v1177_v54  ;;  %v1212_v60 = vpop.f32.mrb[3].mxu1  ;;  %vm946_vm0 = vcmp.lt.s32.totalorder %v1540_v51, 32 }
 0x122   :  { %v1213_v61 = vadd.f32 %v1212_v60, %v1211_v56 }
 0x123   :  { %v802_v62 = vadd.f32 %v1210_v55, %v745_v58  ;;  %v748_v63 = vadd.f32 %v1179_v59, %v1069_v50 }
 0x125   :  { %v805_v0 = vadd.f32 %v1213_v61, %v748_v63  ;;  %v1180_v1 = vpop.f32.mrb[4].mxu0 }
 0x126   :  { %v1181_v2 = vpop.f32.mrb[5].mxu0  ;;  %v1214_v8 = vpop.f32.mrb[4].mxu1 }
 0x127   :  { %v1182_v3 = vadd.f32 %v1181_v2, %v1180_v1  ;;  %v1183_v4 = vpop.f32.mrb[6].mxu0  ;;  %v1215_v9 = vpop.f32.mrb[5].mxu1  ;;  %v1483_v2 = vmov 0.0  }
 0x128   :  { %v1184_v5 = vpop.f32.mrb[7].mxu0  ;;  %v1216_v11 = vadd.f32 %v1215_v9, %v1214_v8  ;;  %v1217_v12 = vpop.f32.mrb[6].mxu1 }
 0x129   :  { %v1185_v6 = vadd.f32 %v1184_v5, %v1183_v4  ;;  %v753_v7 = vadd.f32 %v1182_v3, %v1069_v50  ;;  %v1218_v13 = vpop.f32.mrb[7].mxu1  ;;  %v947_v3 = vsel %vm946_vm0, 1e-06, %v1483_v2 }
 0x12a   :  { %v1219_v15 = vadd.f32 %v1218_v13, %v1217_v12 }
 0x12b   :  { %v756_v10 = vadd.f32 %v1185_v6, %v1069_v50  ;;  %v810_v14 = vadd.f32 %v1216_v11, %v753_v7 }
 0x12d   :  { %v1186_v16 = vpop.f32.mrb[8].mxu0  ;;  %v813_v17 = vadd.f32 %v1219_v15, %v756_v10 }
 0x12e   :  { %v1187_v18 = vpop.f32.mrb[9].mxu0  ;;  %v1220_v23 = vpop.f32.mrb[8].mxu1 }
 0x12f   :  { %v1188_v19 = vadd.f32 %v1187_v18, %v1186_v16  ;;  %v1189_v20 = vpop.f32.mrb[10].mxu0  ;;  %v1221_v25 = vpop.f32.mrb[9].mxu1 }
 0x130   :  { %v1190_v21 = vpop.f32.mrb[11].mxu0  ;;  %v1222_v27 = vadd.f32 %v1221_v25, %v1220_v23  ;;  %v1223_v28 = vpop.f32.mrb[10].mxu1 }
 0x131   :  { %v761_v22 = vadd.f32 %v1188_v19, %v1069_v50  ;;  %v1191_v24 = vadd.f32 %v1190_v21, %v1189_v20  ;;  %v1224_v29 = vpop.f32.mrb[11].mxu1 }
 0x132   :  { %v1225_v31 = vadd.f32 %v1224_v29, %v1223_v28 }
 0x133   :  { %v764_v26 = vadd.f32 %v1191_v24, %v1069_v50  ;;  %v818_v30 = vadd.f32 %v1222_v27, %v761_v22 }
 0x135   :  { %v821_v32 = vadd.f32 %v1225_v31, %v764_v26 }
 0x13d   :  { %v1242_v33 = vpop.f32.mrb[12].mxu0 }
 0x13e   :  { %v1276_v34 = vpop.f32.mrb[12].mxu1  ;;  %v1243_v35 = vpop.f32.mrb[13].mxu0 }
 0x13f   :  { %v1244_v36 = vadd.f32 %v1243_v35, %v1242_v33  ;;  %v1277_v37 = vpop.f32.mrb[13].mxu1  ;;  %v1245_v38 = vpop.f32.mrb[14].mxu0 }
 0x140   :  { %v1278_v39 = vadd.f32 %v1277_v37, %v1276_v34  ;;  %v1279_v40 = vpop.f32.mrb[14].mxu1  ;;  %v1246_v41 = vpop.f32.mrb[15].mxu0 }
 0x141   :  { %v859_v42 = vadd.f32 %v1244_v36, %v802_v62  ;;  %v1247_v43 = vadd.f32 %v1246_v41, %v1245_v38  ;;  %v1280_v44 = vpop.f32.mrb[15].mxu1 }
 0x142   :  { %v1281_v46 = vadd.f32 %v1280_v44, %v1279_v40 }
 0x143   :  { %v916_v47 = vadd.f32 %v1278_v39, %v859_v42  ;;  %v862_v48 = vadd.f32 %v1247_v43, %v805_v0 }
 0x145   :  { %938 = vst [vmem:[#allocation7] sm:$0xff] %v916_v47  ;;  %v919_v49 = vadd.f32 %v1281_v46, %v862_v48  ;;  %v1248_v50 = vpop.f32.mrb[16].mxu0 }
 0x146   :  { %v1282_v52 = vpop.f32.mrb[16].mxu1  ;;  %v1249_v53 = vpop.f32.mrb[17].mxu0 }
 0x147   :  { %939 = vst [vmem:[#allocation7 + $0x8] sm:$0xff] %v919_v49  ;;  %v1250_v54 = vadd.f32 %v1249_v53, %v1248_v50  ;;  %v1283_v55 = vpop.f32.mrb[17].mxu1  ;;  %v1251_v56 = vpop.f32.mrb[18].mxu0 }
 0x148   :  { %v1284_v57 = vadd.f32 %v1283_v55, %v1282_v52  ;;  %v1285_v58 = vpop.f32.mrb[18].mxu1  ;;  %v1252_v59 = vpop.f32.mrb[19].mxu0 }
 0x149   :  { %v867_v60 = vadd.f32 %v1250_v54, %v810_v14  ;;  %v1253_v61 = vadd.f32 %v1252_v59, %v1251_v56  ;;  %v1286_v62 = vpop.f32.mrb[19].mxu1 }
 0x14a   :  { %v1287_v63 = vadd.f32 %v1286_v62, %v1285_v58 }
 0x14b   :  { %v924_v0 = vadd.f32 %v1284_v57, %v867_v60  ;;  %v870_v1 = vadd.f32 %v1253_v61, %v813_v17 }
 0x14d   :  { %940 = vst [vmem:[#allocation7 + $0x10] sm:$0xff] %v924_v0  ;;  %v927_v4 = vadd.f32 %v1287_v63, %v870_v1  ;;  %v1254_v5 = vpop.f32.mrb[20].mxu0  ;;  %v948_v6 = vsub.f32 %v916_v47, %v924_v0 }
 0x14e   :  { %v1288_v7 = vpop.f32.mrb[20].mxu1  ;;  %v1255_v8 = vpop.f32.mrb[21].mxu0 }
 0x14f   :  { %941 = vst [vmem:[#allocation7 + $0x18] sm:$0xff] %v927_v4  ;;  %v1256_v9 = vadd.f32 %v1255_v8, %v1254_v5  ;;  %v1289_v10 = vpop.f32.mrb[21].mxu1  ;;  %v1257_v11 = vpop.f32.mrb[22].mxu0  ;;  %v950_v12 = vadd.f32 %v948_v6, %v947_v3  ;;  %v949_v13 = vsub.f32 %v919_v49, %v927_v4 }
 0x150   :  { %v1290_v14 = vadd.f32 %v1289_v10, %v1288_v7  ;;  %v1291_v15 = vpop.f32.mrb[22].mxu1  ;;  %v1258_v16 = vpop.f32.mrb[23].mxu0 }
 0x151   :  { %v875_v18 = vadd.f32 %v1256_v9, %v818_v30  ;;  %v1259_v19 = vadd.f32 %v1258_v16, %v1257_v11  ;;  %v1292_v17 = vpop.f32.mrb[23].mxu1  ;;  %v952_v20 = vmul.f32 %v950_v12, %v950_v12  ;;  %v951_v21 = vadd.f32 %v949_v13, %v947_v3 }
 0x152   :  { %v1293_v22 = vadd.f32 %v1292_v17, %v1291_v15 }
 0x153   :  { %v932_v23 = vadd.f32 %v1290_v14, %v875_v18  ;;  %v878_v24 = vadd.f32 %v1259_v19, %v821_v32  ;;  %954 = vadd.xlane.f32.xlu0 %v952_v20  ;;  %v953_v26 = vmul.f32 %v951_v21, %v951_v21 }
 0x155   :  { %942 = vst [vmem:[#allocation7 + $0x20] sm:$0xff] %v932_v23  ;;  %v935_v25 = vadd.f32 %v1293_v22, %v878_v24  ;;  %v972_v27 = vsub.f32 %v916_v47, %v932_v23  ;;  %v996_v28 = vsub.f32 %v924_v0, %v932_v23 }
 0x157   :  { %943 = vst [vmem:[#allocation7 + $0x28] sm:$0xff] %v935_v25  ;;  %956 = vadd.xlane.f32.xlu0 %v953_v26  ;;  %v974_v29 = vadd.f32 %v972_v27, %v947_v3  ;;  %v998_v31 = vadd.f32 %v996_v28, %v947_v3  ;;  %v973_v33 = vsub.f32 %v919_v49, %v935_v25 }
 0x158   :  { %v997_v34 = vsub.f32 %v927_v4, %v935_v25 }
 0x159   :  { %v976_v30 = vmul.f32 %v974_v29, %v974_v29  ;;  %v1000_v35 = vmul.f32 %v998_v31, %v998_v31  ;;  %v975_v36 = vadd.f32 %v973_v33, %v947_v3 }
 0x15a   :  { %v999_v38 = vadd.f32 %v997_v34, %v947_v3 }
 0x15b   :  { %978 = vadd.xlane.f32.xlu1 %v976_v30  ;;  %1002 = vadd.xlane.f32.xlu0 %v1000_v35  ;;  %v977_v37 = vmul.f32 %v975_v36, %v975_v36 }
 0x15c   :  { %v1001_v32 = vmul.f32 %v999_v38, %v999_v38 }
 0x15f   :  { %980 = vadd.xlane.f32.xlu1 %v977_v37 }
 0x163   :  { %1004 = vadd.xlane.f32.xlu1 %v1001_v32 }
 0x164   :  { %1436 = shalt.err (!%p1433_p6)
}
 0x165   :  { %s1437_s21 = scalar_lea.hbm %s1591_s3, 768 }
 0x166   :  { %p1438_p7 = scmp.ne.s32.totalorder %s1591_s3, %s1437_s21  ;;  %p1441_p8 = scmp.lt.u32.totalorder %s1437_s21, %s1591_s3 }
 0x168   :  { %p1443_p9 = pnand %p1441_p8, %p1438_p7 }
 0x16a   :  { %1446 = shalt.err (!%p1443_p9)
}
 0x16b   :  { %s1485_s26 = smov 128   ;;  %s1486_s27 = smov 8   ;;  %vm1020_vm3 = vcmp.eq.s32.totalorder %v1540_v51, 0  ;;  %vm1023_vm4 = vcmp.eq.s32.totalorder %v1540_v51, 1  ;;  %vm1028_vm5 = vcmp.eq.s32.totalorder %v1540_v51, 2 }
 0x16c   :  { %1046 = dma.vmem_to_hbm [thread:$0]  %s1041_s17, 768, %s1591_s3, [#allocation4], %s1485_s26, %s1485_s26, %s1486_s27  }
 0x16d   :  { %s1487_s3 = smov [#allocation8]  }
 0x16e   :  { %s1052_s30 = sshll.u32 %s1487_s3, 4  ;;  %s1053_s30 = int_to_ptr.vmem [resolvable:$true] %s1052_s30 }
 0x16f   :  { %s1447_s5 = scalar_lea.vmem %s1053_s30, 256  ;;  %p1452_p11 = scmp.lt.s32.totalorder %s1053_s30, %s1053_s30 }
 0x170   :  { %p1448_p10 = scmp.ne.s32.totalorder %s1053_s30, %s1447_s5  ;;  %p1453_p12 = scmp.lt.s32.totalorder %s1447_s5, %s1447_s5 }
 0x172   :  { %p1454_p13 = por %p1453_p12, %p1452_p11 }
 0x174   :  { %p1455_p0 = pnand %p1454_p13, %p1448_p10 }
 0x1e0   :  { %v955_v39 = vpop.xlane.xlu0 %954 }
 0x1e1   :  { %1369 = vrsqrt.f32 %v955_v39  ;;  %vm960_vm1 = vcmp.eq.f32.partialorder %v955_v39, inf  ;;  %v963_v49 = vand.u32 2147483648, %v955_v39  ;;  %vm962_vm2 = vcmp.eq.f32.partialorder %v955_v39, 0.0 }
 0x1e4   :  { %v957_v40 = vpop.xlane.xlu0 %956 }
 0x1e5   :  { %1371 = vrsqrt.f32 %v957_v40  ;;  %vm967_vm6 = vcmp.eq.f32.partialorder %v957_v40, inf  ;;  %v970_v4 = vand.u32 2147483648, %v957_v40  ;;  %vm969_vm12 = vcmp.eq.f32.partialorder %v957_v40, 0.0 }
 0x1e8   :  { %v979_v41 = vpop.xlane.xlu1 %978  ;;  %v1003_v42 = vpop.xlane.xlu0 %1002 }
 0x1e9   :  { %1373 = vrsqrt.f32 %v979_v41  ;;  %vm984_vm7 = vcmp.eq.f32.partialorder %v979_v41, inf  ;;  %v987_v56 = vand.u32 2147483648, %v979_v41  ;;  %vm986_vm8 = vcmp.eq.f32.partialorder %v979_v41, 0.0 }
 0x1ea   :  { %1375 = vrsqrt.f32 %v1003_v42  ;;  %vm1008_vm9 = vcmp.eq.f32.partialorder %v1003_v42, inf  ;;  %v1011_v59 = vand.u32 2147483648, %v1003_v42  ;;  %vm1010_vm10 = vcmp.eq.f32.partialorder %v1003_v42, 0.0 }
 0x1eb   :  { %v1370_v43 = vpop.eup %1369 }
 0x1ec   :  { %v981_v44 = vpop.xlane.xlu1 %980  ;;  %v959_v45 = vmul.f32 %v1370_v43, %v955_v39 }
 0x1ed   :  { %1377 = vrsqrt.f32 %v981_v44  ;;  %vm991_vm11 = vcmp.eq.f32.partialorder %v981_v44, inf  ;;  %v994_v5 = vand.u32 2147483648, %v981_v44  ;;  %vm993_vm13 = vcmp.eq.f32.partialorder %v981_v44, 0.0 }
 0x1ee   :  { %v961_v48 = vsel %vm960_vm1, %v955_v39, %v959_v45 }
 0x1ef   :  { %v1372_v47 = vpop.eup %1371  ;;  %v964_v53 = vsel %vm962_vm2, %v963_v49, %v961_v48 }
 0x1f0   :  { %v1005_v46 = vpop.xlane.xlu1 %1004  ;;  %v966_v54 = vmul.f32 %v1372_v47, %v957_v40  ;;  %v1021_v63 = vsel %vm1020_vm3, %v964_v53, 0.0 }
 0x1f1   :  { %1379 = vrsqrt.f32 %v1005_v46  ;;  %vm1015_vm14 = vcmp.eq.f32.partialorder %v1005_v46, inf  ;;  %v1018_v15 = vand.u32 2147483648, %v1005_v46  ;;  %vm1017_vm15 = vcmp.eq.f32.partialorder %v1005_v46, 0.0 }
 0x1f2   :  { %v968_v0 = vsel %vm967_vm6, %v957_v40, %v966_v54 }
 0x1f3   :  { %v1374_v50 = vpop.eup %1373  ;;  %v971_v10 = vsel %vm969_vm12, %v970_v4, %v968_v0 }
 0x1f4   :  { %v1376_v52 = vpop.eup %1375  ;;  %v983_v55 = vmul.f32 %v1374_v50, %v979_v41  ;;  %v1022_v18 = vsel %vm1020_vm3, %v971_v10, 0.0 }
 0x1f5   :  { %v1007_v57 = vmul.f32 %v1376_v52, %v1003_v42 }
 0x1f6   :  { %v985_v58 = vsel %vm984_vm7, %v979_v41, %v983_v55 }
 0x1f7   :  { %v1378_v60 = vpop.eup %1377  ;;  %v988_v61 = vsel %vm986_vm8, %v987_v56, %v985_v58  ;;  %v1009_v62 = vsel %vm1008_vm9, %v1003_v42, %v1007_v57 }
 0x1f8   :  { %v1012_v1 = vsel %vm1010_vm10, %v1011_v59, %v1009_v62  ;;  %v990_v2 = vmul.f32 %v1378_v60, %v981_v44  ;;  %v1024_v3 = vsel %vm1023_vm4, %v988_v61, 0.0 }
 0x1f9   :  { %v1026_v6 = vadd.f32 %v1024_v3, %v1021_v63  ;;  %v1029_v8 = vsel %vm1028_vm5, %v1012_v1, 0.0 }
 0x1fa   :  { %v992_v7 = vsel %vm991_vm11, %v981_v44, %v990_v2 }
 0x1fb   :  { %v1380_v9 = vpop.eup %1379  ;;  %v995_v11 = vsel %vm993_vm13, %v994_v5, %v992_v7  ;;  %v1031_v12 = vadd.f32 %v1029_v8, %v1026_v6 }
 0x1fc   :  { %v1014_v13 = vmul.f32 %v1380_v9, %v1005_v46  ;;  %v1025_v14 = vsel %vm1023_vm4, %v995_v11, 0.0 }
 0x1fd   :  { %1033 = vst [vmem:[#allocation8] sm:$0xff] %v1031_v12  ;;  %v1027_v17 = vadd.f32 %v1025_v14, %v1022_v18 }
 0x1fe   :  { %v1016_v16 = vsel %vm1015_vm14, %v1005_v46, %v1014_v13 }
 0x1ff   :  { %v1019_v19 = vsel %vm1017_vm15, %v1018_v15, %v1016_v16 }
 0x200   :  { %v1030_v20 = vsel %vm1028_vm5, %v1019_v19, 0.0 }
 0x201   :  { %v1032_v21 = vadd.f32 %v1030_v20, %v1027_v17 }
 0x203   :  { %1034 = vst [vmem:[#allocation8 + $0x8] sm:$0xff] %v1032_v21 }
 0x204   :  { %1458 = shalt.err (!%p1455_p0)
}
 0x205   :  { %s1459_s8 = scalar_lea.hbm %s1592_s4, 256 }
 0x206   :  { %p1460_p1 = scmp.ne.s32.totalorder %s1592_s4, %s1459_s8  ;;  %p1463_p2 = scmp.lt.u32.totalorder %s1459_s8, %s1592_s4 }
 0x208   :  { %p1465_p3 = pnand %p1463_p2, %p1460_p1 }
 0x20a   :  { %1468 = shalt.err (!%p1465_p3)
}
 0x20b   :  { %1058 = dma.vmem_to_hbm [thread:$0]  %s1053_s30, 256, %s1592_s4, [#allocation9], %s1485_s26, %s1485_s26, %s1486_s27  }
 0x20c   :  { %1473 = dma.done.wait [#allocation4], 768  }
 0x20d   :  { %1474 = vsyncadd [#allocation4], 4294966528 }
 0x20e   :  { %1475 = dma.done.wait [#allocation9], 256  }
 0x20f   :  { %1476 = vsyncadd [#allocation9], 4294967040 }
 0x210   :  { %1065 = vsyncpa [#allocation3], 1 }
 0x211   :  { %1066 = vsyncpa [#allocation6], 1 }
 0x212   :  { %1067 = vsyncpa [#allocation4], 1 }
 0x213   :  { %1068 = vsyncpa [#allocation9], 1 }

</bundles_post_ra>
